<compile_context>
chip_gen: v5e
topology: v5e:2x2
jax: 0.10.0
libtpu: 0.0.40
codegen_flags: <defaults>
</compile_context>

<pallas_src>
import functools

import jax
import jax.numpy as jnp
from jax import lax
from jax.experimental import pallas as pl
from jax.experimental.pallas import tpu as pltpu

DROPOUT_P = 0.1
_KEEP_SCALE = 1.0 / (1.0 - DROPOUT_P)
# Drop iff hash31 < thresh; thresh/2^31 ~= DROPOUT_P.
_DROP_THRESH = int(round(DROPOUT_P * (1 << 31)))

# Signed-int32 views of the hash constants (wrapping int32 multiply is intentional).
_ROW_MULT = 0x9E3779B1 - (1 << 32)   # golden-ratio odd constant
_MIX_MULT = 0x7FEB352D               # lowbias32-style multiplier (fits in int32)


def _round_up(x, m):
    return (x + m - 1) // m * m


def _keep_mask(shape, seed, row_offset):
    """Stateless per-element dropout keep mask, P(drop) = DROPOUT_P.

    ~10 int32 VPU ops / element: one counter multiply + one xorshift-mul-xorshift
    mixing round (logical shifts emulated as ashr+mask).  Deterministic in
    (seed, absolute row, column) -> independent of tile size and TensorCore.
    """
    rows = lax.broadcasted_iota(jnp.int32, shape, 0) + row_offset
    cols = lax.broadcasted_iota(jnp.int32, shape, 1)
    z = rows * _ROW_MULT + cols + seed
    z = z ^ ((z >> 15) & 0x1FFFF)
    z = z * _MIX_MULT
    z = z ^ ((z >> 16) & 0xFFFF)
    r = z & 0x7FFFFFFF                       # uniform-ish in [0, 2^31)
    return r >= _DROP_THRESH


def _finish(y, b_ref, o_ref, seed, *, training, tile):
    """Add bias, apply (optional) dropout, store."""
    y = y + b_ref[...]
    if training:
        keep = _keep_mask(y.shape, seed, pl.program_id(0) * tile)
        y = jnp.where(keep, y * _KEEP_SCALE, 0.0)
    o_ref[...] = y.astype(o_ref.dtype)


def _fused_kernel(seed_ref, ids_ref, tbl_ref, b_ref, o_ref, *,
                  training, tile, vocab, matmul_dtype):
    """Small-vocab path: gather+Linear fused as one one-hot matmul vs (V, D) table."""
    ids = ids_ref[...]                                              # (tile, 1) int32
    onehot = ids == lax.broadcasted_iota(jnp.int32, (tile, vocab), 1)
    tbl = tbl_ref[...]
    if matmul_dtype is not None:                                    # optional bf16 MXU
        onehot = onehot.astype(matmul_dtype)
        tbl = tbl.astype(matmul_dtype)
    else:                                                           # exact f32 lookup
        onehot = onehot.astype(tbl.dtype)
    y = jnp.dot(onehot, tbl, preferred_element_type=jnp.float32)    # (tile, D)
    _finish(y, b_ref, o_ref, seed_ref[0], training=training, tile=tile)


def _gather_kernel(seed_ref, ids_ref, emb_hbm, w_ref, b_ref, o_ref, xbuf, sem, *,
                   training, tile, matmul_dtype):
    """Large-vocab path: DMA-gather rows from the HBM table, then project."""
    base = pl.program_id(0) * tile

    # TODO(synk): double-buffer the row DMAs across grid steps to overlap the gather
    # with the previous tile's projection matmul.
    @pl.loop(0, tile)
    def _issue(t):
        pltpu.make_async_copy(emb_hbm.at[ids_ref[base + t]], xbuf.at[t],
                              sem.at[0]).start()

    @pl.loop(0, tile)
    def _drain(t):
        # Same-sized wait descriptor per completed row copy (standard pattern).
        pltpu.make_async_copy(emb_hbm.at[0], xbuf.at[0], sem.at[0]).wait()

    x = xbuf[...]                                                    # (tile, E)
    w = w_ref[...]                                                   # (E, D)
    if matmul_dtype is not None:                                     # bf16 MXU inputs
        x = x.astype(matmul_dtype)
        w = w.astype(matmul_dtype)
    y = jnp.dot(x, w, preferred_element_type=jnp.float32)            # f32 accumulate
    _finish(y, b_ref, o_ref, seed_ref[0], training=training, tile=tile)


def embed_trainer_forward(idxs, emb_w, lin_w_t, lin_b, seed, *, training=True,
                          tm=512, matmul_dtype=jnp.bfloat16,
                          fused_matmul_dtype=None, out_dtype=jnp.float32,
                          max_fused_vocab=1024, max_fused_onehot_bytes=2 << 20):
    """Pallas TPU implementation of EmbedTrainer.forward.

    idxs: (B, T) int ids; emb_w: (V, E); lin_w_t: (E, D) (= torch Linear weight.T);
    lin_b: (D,).  Returns (B, T, D) in out_dtype (default f32 = torch semantics).

    matmul_dtype: MXU input dtype for the projection on the large-vocab path
      (default bf16, f32 accumulation).  fused_matmul_dtype: dtype of the fused
      one-hot matmul (default None = f32, keeps the lookup exact).
    """
    B, T = idxs.shape
    V, E = emb_w.shape
    D = lin_w_t.shape[1]
    N = B * T

    # Token tile: 128-multiple when there is enough work; otherwise one (nearly)
    # pad-free block (multiple of 16 so bf16 sublane packing stays dense).
    tm = max(128, _round_up(tm, 128))
    tile = tm if N >= tm else max(16, _round_up(N, 16))
    n_pad = _round_up(N, tile)
    grid = (n_pad // tile,)

    flat_ids = idxs.reshape(-1).astype(jnp.int32)
    if n_pad != N:
        flat_ids = jnp.pad(flat_ids, (0, n_pad - N))
    seed_arr = jnp.asarray([seed], dtype=jnp.int32)
    bias2d = lin_b.reshape(1, D).astype(jnp.float32)

    # Per-generation VMEM budget: phys-16MiB capped at 100MiB, never below 32MiB.
    try:
        phys = int(pltpu.get_tpu_info().vmem_capacity_bytes)
    except Exception:
        phys = 64 << 20                      # conservative (v7x per-core VMEM)
    vmem_limit = int(max(32 << 20, min(phys - (16 << 20), 100 << 20)))
    cparams = pltpu.CompilerParams(dimension_semantics=("parallel",),
                                   vmem_limit_bytes=vmem_limit)

    # Fuse only while the one-hot stays cheap: gate on vocab size AND onehot bytes.
    fuse = (V <= max_fused_vocab) and (tile * V * 4 <= max_fused_onehot_bytes)

    def launch(single_buffer_invariants):
        def inv_spec(shape):
            idx_map = lambda i, *prefetch: (0,) * len(shape)
            if single_buffer_invariants and hasattr(pl, "Buffered"):
                try:
                    return pl.BlockSpec(shape, idx_map, pipeline_mode=pl.Buffered(1))
                except TypeError:
                    pass
            return pl.BlockSpec(shape, idx_map)

        if fuse:
            # Fold the Linear into the table once (tiny XLA matmul): (V, D).
            fused_tbl = jnp.dot(emb_w.astype(jnp.float32),
                                lin_w_t.astype(jnp.float32),
                                precision=lax.Precision.HIGHEST)
            kernel = functools.partial(_fused_kernel, training=training, tile=tile,
                                       vocab=V, matmul_dtype=fused_matmul_dtype)
            return pl.pallas_call(
                kernel,
                out_shape=jax.ShapeDtypeStruct((n_pad, D), out_dtype),
                grid_spec=pltpu.PrefetchScalarGridSpec(
                    num_scalar_prefetch=1,                          # seed -> SMEM
                    grid=grid,
                    in_specs=[
                        pl.BlockSpec((tile, 1), lambda i, s: (i, 0)),  # ids tile
                        inv_spec((V, D)),                              # fused table
                        inv_spec((1, D)),                              # bias
                    ],
                    out_specs=pl.BlockSpec((tile, D), lambda i, s: (i, 0)),
                ),
                compiler_params=cparams,
            )(seed_arr, flat_ids.reshape(n_pad, 1), fused_tbl, bias2d)

        kernel = functools.partial(_gather_kernel, training=training, tile=tile,
                                   matmul_dtype=matmul_dtype)
        return pl.pallas_call(
            kernel,
            out_shape=jax.ShapeDtypeStruct((n_pad, D), out_dtype),
            grid_spec=pltpu.PrefetchScalarGridSpec(
                num_scalar_prefetch=2,                              # seed + ids -> SMEM
                grid=grid,
                in_specs=[
                    pl.BlockSpec(memory_space=pl.ANY),              # emb table in HBM
                    inv_spec((E, D)),                               # expansion weight
                    inv_spec((1, D)),                               # bias
                ],
                out_specs=pl.BlockSpec((tile, D), lambda i, s, ids: (i, 0)),
                scratch_shapes=[
                    pltpu.VMEM((tile, E), emb_w.dtype),             # gathered rows
                    pltpu.SemaphoreType.DMA((1,)),
                ],
            ),
            compiler_params=cparams,
        )(seed_arr, flat_ids, emb_w, lin_w_t, bias2d)

    try:
        out = launch(single_buffer_invariants=True)
    except Exception:
        # pl.Buffered(1) not supported by this jax build -> retry double-buffered.
        out = launch(single_buffer_invariants=False)

    if n_pad != N:
        out = out[:N]
    return out.reshape(B, T, D)


if __name__ == "__main__":
    B, T = 2, 8
    E, D = 32, 128

    key = jax.random.PRNGKey(0)
    k_emb, k_w, k_b, k_idx, k_emb2, k_idx2 = jax.random.split(key, 6)

    bound = 1.0 / (E ** 0.5)           # torch nn.Linear default init range
    lin_w = jax.random.uniform(k_w, (D, E), minval=-bound, maxval=bound,
                               dtype=jnp.float32)       # torch layout (out, in)
    lin_w_t = lin_w.T                                    # kernel layout (E, D)
    lin_b = jax.random.uniform(k_b, (D,), minval=-bound, maxval=bound,
                               dtype=jnp.float32)

    # ---------- small vocabulary: fused one-hot (gather+Linear in one matmul) ----------
    V = 64
    emb_w = jax.random.normal(k_emb, (V, E), dtype=jnp.float32)
    idxs = jax.random.randint(k_idx, (B, T), 0, V, dtype=jnp.int32)

    x_g = jnp.take(emb_w, idxs.reshape(-1), axis=0)
    ref = (jnp.dot(x_g, lin_w_t, precision=lax.Precision.HIGHEST)
           + lin_b).reshape(B, T, D)

    out_eval = embed_trainer_forward(idxs, emb_w, lin_w_t, lin_b, seed=0,
                                     training=False)
    jax.block_until_ready(out_eval)
    assert out_eval.shape == (B, T, D)
    assert jnp.allclose(out_eval, ref, atol=1e-3, rtol=1e-3), "fused eval mismatch"

    # Training mode: kept elements must equal ref / (1 - p); some but not all dropped.
    out_train = embed_trainer_forward(idxs, emb_w, lin_w_t, lin_b, seed=42,
                                      training=True)
    jax.block_until_ready(out_train)
    assert out_train.shape == (B, T, D)
    scaled = ref * _KEEP_SCALE
    kept = out_train != 0.0
    err = jnp.where(kept, jnp.abs(out_train - scaled), 0.0)
    assert float(err.max()) < 1e-2, "kept elements do not match scaled reference"
    n_drop = int(jnp.sum(~kept))
    assert 0 < n_drop < out_train.size, "dropout mask looks degenerate"

    # ---------- large vocabulary: in-kernel DMA-gather path (bf16 projection) ----------
    V2 = 4096
    emb_w2 = jax.random.normal(k_emb2, (V2, E), dtype=jnp.float32)
    idxs2 = jax.random.randint(k_idx2, (B, T), 0, V2, dtype=jnp.int32)

    x_g2 = jnp.take(emb_w2, idxs2.reshape(-1), axis=0)
    ref2 = (jnp.dot(x_g2.astype(jnp.bfloat16), lin_w_t.astype(jnp.bfloat16),
                    preferred_element_type=jnp.float32)
            + lin_b).reshape(B, T, D)

    out2 = embed_trainer_forward(idxs2, emb_w2, lin_w_t, lin_b, seed=0,
                                 training=False)
    jax.block_until_ready(out2)
    assert out2.shape == (B, T, D)
    assert jnp.allclose(out2, ref2, atol=5e-3, rtol=5e-3), "DMA-gather eval mismatch"

    print("KERNEL_OK")
</pallas_src>

<mosaic_0001>
module attributes {stable_mosaic.version = 11 : i64} {
  func.func @_fused_kernel(%arg0: i32, %arg1: memref<1xi32, #tpu.memory_space<smem>>, %arg2: memref<16x1xi32, #tpu.memory_space<vmem>>, %arg3: memref<64x128xf32, #tpu.memory_space<vmem>>, %arg4: memref<1x128xf32, #tpu.memory_space<vmem>>, %arg5: memref<16x128xf32, #tpu.memory_space<vmem>>) attributes {dimension_semantics = [#tpu.dimension_semantics<parallel>], iteration_bounds = array<i64: 1>, scalar_prefetch = 1 : i64, scratch_operands = 0 : i64, tpu.core_type = #tpu.core_type<tc>, window_params = [{transform_indices = @transform_0, window_bounds = array<i64: 16, 1>}, {pipeline_mode = #tpu.pipeline_mode<synchronous>, transform_indices = @transform_1, window_bounds = array<i64: 64, 128>}, {pipeline_mode = #tpu.pipeline_mode<synchronous>, transform_indices = @transform_2, window_bounds = array<i64: 1, 128>}, {transform_indices = @transform_3, window_bounds = array<i64: 16, 128>}]} {
    %c0 = arith.constant 0 : index
    %c0_0 = arith.constant 0 : index
    %0 = vector.load %arg2[%c0, %c0_0] : memref<16x1xi32, #tpu.memory_space<vmem>>, vector<16x1xi32>
    %1 = tpu.iota {dimensions = array<i32: 1>} : vector<16x64xi32>
    %2 = vector.broadcast %0 : vector<16x1xi32> to vector<16x64xi32>
    %3 = arith.cmpi eq, %2, %1 : vector<16x64xi32>
    %c0_1 = arith.constant 0 : index
    %c0_2 = arith.constant 0 : index
    %4 = vector.load %arg3[%c0_1, %c0_2] : memref<64x128xf32, #tpu.memory_space<vmem>>, vector<64x128xf32>
    %5 = arith.extui %3 : vector<16x64xi1> to vector<16x64xi32>
    %6 = arith.sitofp %5 : vector<16x64xi32> to vector<16x64xf32>
    %cst = arith.constant dense<0.000000e+00> : vector<16x128xf32>
    %7 = tpu.matmul %6, %4, %cst {dimension_numbers = #tpu.dot_dimension_numbers<[1], [0], [0], [1], [0, 0, 1, 1], [], []>} : vector<16x64xf32>, vector<64x128xf32>, vector<16x128xf32> -> vector<16x128xf32>
    %c0_3 = arith.constant 0 : index
    %c0_4 = arith.constant 0 : index
    %8 = vector.load %arg4[%c0_3, %c0_4] : memref<1x128xf32, #tpu.memory_space<vmem>>, vector<1x128xf32>
    %9 = vector.broadcast %8 : vector<1x128xf32> to vector<16x128xf32>
    %10 = arith.addf %7, %9 : vector<16x128xf32>
    %c0_5 = arith.constant 0 : index
    %c0_6 = arith.constant 0 : index
    %11 = vector.load %arg5[%c0_5, %c0_6] : memref<16x128xf32, #tpu.memory_space<vmem>>, vector<16x128xf32>
    tpu.vector_store %arg5[%c0_5, %c0_6], %10 {strides = array<i32>} : memref<16x128xf32, #tpu.memory_space<vmem>>, vector<16x128xf32>,
    return
  }
  func.func @transform_0(%arg0: i32, %arg1: memref<1xi32, #tpu.memory_space<smem>>) -> (i32, i32) {
    %c0_i32 = arith.constant 0 : i32
    %c0_i32_0 = arith.constant 0 : i32
    return %arg0, %c0_i32 : i32, i32
  }
  func.func @transform_1(%arg0: i32, %arg1: memref<1xi32, #tpu.memory_space<smem>>) -> (i32, i32) {
    %c0_i32 = arith.constant 0 : i32
    %c0_i32_0 = arith.constant 0 : i32
    %c0_i32_1 = arith.constant 0 : i32
    return %c0_i32, %c0_i32_0 : i32, i32
  }
  func.func @transform_2(%arg0: i32, %arg1: memref<1xi32, #tpu.memory_space<smem>>) -> (i32, i32) {
    %c0_i32 = arith.constant 0 : i32
    %c0_i32_0 = arith.constant 0 : i32
    %c0_i32_1 = arith.constant 0 : i32
    return %c0_i32, %c0_i32_0 : i32, i32
  }
  func.func @transform_3(%arg0: i32, %arg1: memref<1xi32, #tpu.memory_space<smem>>) -> (i32, i32) {
    %c0_i32 = arith.constant 0 : i32
    %c0_i32_0 = arith.constant 0 : i32
    return %arg0, %c0_i32 : i32, i32
  }
}

module attributes {stable_mosaic.version = 11 : i64} {
  func.func @_fused_kernel(%arg0: i32, %arg1: memref<1xi32, #tpu.memory_space<smem>>, %arg2: memref<16x1xi32, #tpu.memory_space<vmem>>, %arg3: memref<64x128xf32, #tpu.memory_space<vmem>>, %arg4: memref<1x128xf32, #tpu.memory_space<vmem>>, %arg5: memref<16x128xf32, #tpu.memory_space<vmem>>) attributes {dimension_semantics = [#tpu.dimension_semantics<parallel>], iteration_bounds = array<i64: 1>, scalar_prefetch = 1 : i64, scratch_operands = 0 : i64, tpu.core_type = #tpu.core_type<tc>, window_params = [{transform_indices = @transform_0, window_bounds = array<i64: 16, 1>}, {pipeline_mode = #tpu.pipeline_mode<synchronous>, transform_indices = @transform_1, window_bounds = array<i64: 64, 128>}, {pipeline_mode = #tpu.pipeline_mode<synchronous>, transform_indices = @transform_2, window_bounds = array<i64: 1, 128>}, {transform_indices = @transform_3, window_bounds = array<i64: 16, 128>}]} {
    %c0 = arith.constant 0 : index
    %c0_0 = arith.constant 0 : index
    %0 = vector.load %arg2[%c0, %c0_0] : memref<16x1xi32, #tpu.memory_space<vmem>>, vector<16x1xi32>
    %1 = tpu.iota {dimensions = array<i32: 1>} : vector<16x64xi32>
    %2 = vector.broadcast %0 : vector<16x1xi32> to vector<16x64xi32>
    %3 = arith.cmpi eq, %2, %1 : vector<16x64xi32>
    %c0_1 = arith.constant 0 : index
    %c0_2 = arith.constant 0 : index
    %4 = vector.load %arg3[%c0_1, %c0_2] : memref<64x128xf32, #tpu.memory_space<vmem>>, vector<64x128xf32>
    %5 = arith.extui %3 : vector<16x64xi1> to vector<16x64xi32>
    %6 = arith.sitofp %5 : vector<16x64xi32> to vector<16x64xf32>
    %cst = arith.constant dense<0.000000e+00> : vector<16x128xf32>
    %7 = tpu.matmul %6, %4, %cst {dimension_numbers = #tpu.dot_dimension_numbers<[1], [0], [0], [1], [0, 0, 1, 1], [], []>} : vector<16x64xf32>, vector<64x128xf32>, vector<16x128xf32> -> vector<16x128xf32>
    %c0_3 = arith.constant 0 : index
    %c0_4 = arith.constant 0 : index
    %8 = vector.load %arg4[%c0_3, %c0_4] : memref<1x128xf32, #tpu.memory_space<vmem>>, vector<1x128xf32>
    %9 = vector.broadcast %8 : vector<1x128xf32> to vector<16x128xf32>
    %10 = arith.addf %7, %9 : vector<16x128xf32>
    %c0_5 = arith.constant 0 : index
    %c0_6 = arith.constant 0 : index
    %11 = vector.load %arg5[%c0_5, %c0_6] : memref<16x128xf32, #tpu.memory_space<vmem>>, vector<16x128xf32>
    tpu.vector_store %arg5[%c0_5, %c0_6], %10 {strides = array<i32>} : memref<16x128xf32, #tpu.memory_space<vmem>>, vector<16x128xf32>,
    return
  }
  func.func @transform_0(%arg0: i32, %arg1: memref<1xi32, #tpu.memory_space<smem>>) -> (i32, i32) {
    %c0_i32 = arith.constant 0 : i32
    %c0_i32_0 = arith.constant 0 : i32
    return %arg0, %c0_i32 : i32, i32
  }
  func.func @transform_1(%arg0: i32, %arg1: memref<1xi32, #tpu.memory_space<smem>>) -> (i32, i32) {
    %c0_i32 = arith.constant 0 : i32
    %c0_i32_0 = arith.constant 0 : i32
    %c0_i32_1 = arith.constant 0 : i32
    return %c0_i32, %c0_i32_0 : i32, i32
  }
  func.func @transform_2(%arg0: i32, %arg1: memref<1xi32, #tpu.memory_space<smem>>) -> (i32, i32) {
    %c0_i32 = arith.constant 0 : i32
    %c0_i32_0 = arith.constant 0 : i32
    %c0_i32_1 = arith.constant 0 : i32
    return %c0_i32, %c0_i32_0 : i32, i32
  }
  func.func @transform_3(%arg0: i32, %arg1: memref<1xi32, #tpu.memory_space<smem>>) -> (i32, i32) {
    %c0_i32 = arith.constant 0 : i32
    %c0_i32_0 = arith.constant 0 : i32
    return %arg0, %c0_i32 : i32, i32
  }
}

</mosaic_0001>

<bundles_post_ra>
// kernel: tpu_custom_call.1
= control target key start
LH: loop header
LB: loop body
LE: loop exit
PB: predicated region body
PF: predicated region fallthrough
CT: control target
= control target key end

     0   :  { %10 = vsyncpa [#allocation5], 0  ;;  %s236_s0 = inlined_call_operand.<no memory space> [shape: s32[1], index: 0, kind: input, shape index: {}]   ;;  %s237_s1 = inlined_call_operand.vmem [shape: s32[16,1], index: 1, kind: input, shape index: {}]   ;;  %s238_s2 = inlined_call_operand.hbm [shape: f32[64,128], index: 2, kind: input, shape index: {}]   ;;  %s239_s3 = inlined_call_operand.vmem [shape: f32[1,128], index: 3, kind: input, shape index: {}]   ;;  %s240_s4 = inlined_call_operand.hbm [shape: f32[16,128], index: 4, kind: output, shape index: {}]  }
   0x1   :  { %11 = vsyncpa [#allocation6], 0  ;;  %s18_s17 = sshll.u32 %s238_s2, 4  ;;  %s184_s0 = smov [#allocation4]   ;;  %s19_s17 = int_to_ptr.hbm [resolvable:$true] %s18_s17 }
   0x2   :  { %s20_s18 = sshll.u32 %s184_s0, 4  ;;  %s185_s19 = smov 128   ;;  %s21_s18 = int_to_ptr.vmem [resolvable:$true] %s20_s18 }
   0x3   :  { %s186_s20 = smov 8  }
   0x4   :  { %26 = dma.hbm_to_vmem [thread:$0]  %s19_s17, 1024, %s21_s18, [#allocation5], %s185_s19, %s185_s19, %s186_s20  }
   0x5   :  { %180 = dma.done.wait [#allocation5], 1024  }
   0x6   :  { %181 = vsyncadd [#allocation5], 4294966272  ;;  %v187_v0 = vmov 0   ;;  %v33_v1 = vld [vmem:[%s237_s1] sm:$0xff]  ;;  %v52_v2 = vld [vmem:[#allocation4 + $0x38] sm:$0xff]  ;;  %v35_v11 = vlaneseq  ;;  %vm61_vm0 = vcmask 523264  }
   0x7   :  { %130 = vset.pattern.permute.xlu0 %v187_v0  ;;  %76 = vmatpush.msra.mxu0 %v52_v2  ;;  %v51_v3 = vld [vmem:[#allocation4 + $0x30] sm:$0xff]  ;;  %v50_v4 = vld [vmem:[#allocation4 + $0x28] sm:$0xff]  ;;  %v49_v5 = vld [vmem:[#allocation4 + $0x20] sm:$0xff]  ;;  %v188_v14 = vmov 0.0   ;;  %s189_s25 = smov [#allocation7]   ;;  %s99_s29 = sshll.u32 %s240_s4, 4  ;;  %s100_s29 = int_to_ptr.hbm [resolvable:$true] %s99_s29 }
   0x8   :  { %38 = vperm.xlu0 %130, %v33_v1   ;;  %116 = vmatpush.msra.mxu1 %v52_v2  ;;  %v34_v6 = vld [vmem:[%s237_s1 + $0x8] sm:$0xff]  ;;  %v48_v7 = vld [vmem:[#allocation4 + $0x18] sm:$0xff]  ;;  %v47_v8 = vld [vmem:[#allocation4 + $0x10] sm:$0xff]  ;;  %v36_v12 = vand.u32 127, %v35_v11  ;;  %s97_s26 = sshll.u32 %s189_s25, 4  ;;  %s98_s26 = int_to_ptr.vmem [resolvable:$true] %s97_s26 }
   0x9   :  { %77 = vmatpush.msra.mxu0 %v51_v3  ;;  %v46_v9 = vld [vmem:[#allocation4 + $0x8] sm:$0xff]  ;;  %v45_v10 = vld [vmem:[#allocation4] sm:$0xff] }
   0xa   :  { %117 = vmatpush.msra.mxu1 %v51_v3  ;;  %v131_v18 = vld [vmem:[%s239_s3] ss:$0 sm:$0xff] }
   0xb   :  { %78 = vmatpush.msra.mxu0 %v50_v4 }
   0xc   :  { %118 = vmatpush.msra.mxu1 %v50_v4 }
   0xd   :  { %79 = vmatpush.msra.mxu0 %v49_v5 }
   0xe   :  { %119 = vmatpush.msra.mxu1 %v49_v5 }
   0xf   :  { %80 = vmatpush.msra.mxu0 %v48_v7 }
  0x10   :  { %41 = vperm.xlu0 %130, %v34_v6   ;;  %120 = vmatpush.msra.mxu1 %v48_v7 }
  0x11   :  { %81 = vmatpush.msra.mxu0 %v47_v8 }
  0x12   :  { %121 = vmatpush.msra.mxu1 %v47_v8 }
  0x13   :  { %82 = vmatpush.msra.mxu0 %v46_v9 }
  0x14   :  { %122 = vmatpush.msra.mxu1 %v46_v9 }
  0x15   :  { %83 = vmatpush.msra.mxu0 %v45_v10 }
  0x16   :  { %123 = vmatpush.msra.mxu1 %v45_v10 }
  0x7a   :  { %v39_v13 = vpop.permute.xlu0 %38 }
  0x7b   :  { %vm43_vm1 = vcmp.eq.s32.totalorder %v39_v13, %v36_v12 }
  0x7c   :  { %v112_v15 = vsel %vm43_vm1, 1.0, %v188_v14 }
  0x7d   :  { %114 = vmatmul.msk.f32.vlgmr.msra.gmra.mxu0 %vm61_vm0, %v112_v15 }
  0x82   :  { %v42_v16 = vpop.permute.xlu0 %41 }
  0x83   :  { %vm44_vm2 = vcmp.eq.s32.totalorder %v42_v16, %v36_v12 }
  0x84   :  { %v113_v17 = vsel %vm44_vm2, 1.0, %v188_v14 }
  0x85   :  { %115 = vmatmul.msk.f32.vlgmr.msra.gmra.mxu1 %vm61_vm0, %v113_v17 }
  0xfa   :  { %v85_v19 = vpop.f32.mrf.mxu0 }
  0xfb   :  { %v86_v20 = vadd.f32 %v131_v18, %v85_v19 }
  0xfd   :  { %91 = vst [vmem:[#allocation7] sm:$0xff] %v86_v20 }
 0x102   :  { %v88_v21 = vpop.f32.mrf.mxu1 }
 0x103   :  { %v89_v22 = vadd.f32 %v131_v18, %v88_v21 }
 0x105   :  { %92 = vst [vmem:[#allocation7 + $0x8] sm:$0xff] %v89_v22 }
 0x106   :  { %105 = dma.vmem_to_hbm [thread:$0]  %s98_s26, 256, %s100_s29, [#allocation6], %s185_s19, %s185_s19, %s186_s20  }
 0x107   :  { %182 = dma.done.wait [#allocation6], 256  }
 0x108   :  { %183 = vsyncadd [#allocation6], 4294967040 }
 0x109   :  { %110 = vsyncpa [#allocation5], 1 }
 0x10a   :  { %111 = vsyncpa [#allocation6], 1 }

// kernel: tpu_custom_call.1
= control target key start
LH: loop header
LB: loop body
LE: loop exit
PB: predicated region body
PF: predicated region fallthrough
CT: control target
= control target key end

     0   :  { %10 = vsyncpa [#allocation5], 0  ;;  %s236_s0 = inlined_call_operand.<no memory space> [shape: s32[1], index: 0, kind: input, shape index: {}]   ;;  %s237_s1 = inlined_call_operand.vmem [shape: s32[16,1], index: 1, kind: input, shape index: {}]   ;;  %s238_s2 = inlined_call_operand.hbm [shape: f32[64,128], index: 2, kind: input, shape index: {}]   ;;  %s239_s3 = inlined_call_operand.vmem [shape: f32[1,128], index: 3, kind: input, shape index: {}]   ;;  %s240_s4 = inlined_call_operand.hbm [shape: f32[16,128], index: 4, kind: output, shape index: {}]  }
   0x1   :  { %11 = vsyncpa [#allocation6], 0  ;;  %s18_s17 = sshll.u32 %s238_s2, 4  ;;  %s184_s0 = smov [#allocation4]   ;;  %s19_s17 = int_to_ptr.hbm [resolvable:$true] %s18_s17 }
   0x2   :  { %s20_s18 = sshll.u32 %s184_s0, 4  ;;  %s185_s19 = smov 128   ;;  %s21_s18 = int_to_ptr.vmem [resolvable:$true] %s20_s18 }
   0x3   :  { %s186_s20 = smov 8  }
   0x4   :  { %26 = dma.hbm_to_vmem [thread:$0]  %s19_s17, 1024, %s21_s18, [#allocation5], %s185_s19, %s185_s19, %s186_s20  }
   0x5   :  { %180 = dma.done.wait [#allocation5], 1024  }
   0x6   :  { %181 = vsyncadd [#allocation5], 4294966272  ;;  %v187_v0 = vmov 0   ;;  %v33_v1 = vld [vmem:[%s237_s1] sm:$0xff]  ;;  %v52_v2 = vld [vmem:[#allocation4 + $0x38] sm:$0xff]  ;;  %v35_v11 = vlaneseq  ;;  %vm61_vm0 = vcmask 523264  }
   0x7   :  { %130 = vset.pattern.permute.xlu0 %v187_v0  ;;  %76 = vmatpush.msra.mxu0 %v52_v2  ;;  %v51_v3 = vld [vmem:[#allocation4 + $0x30] sm:$0xff]  ;;  %v50_v4 = vld [vmem:[#allocation4 + $0x28] sm:$0xff]  ;;  %v49_v5 = vld [vmem:[#allocation4 + $0x20] sm:$0xff]  ;;  %v188_v14 = vmov 0.0   ;;  %s189_s25 = smov [#allocation7]   ;;  %s99_s29 = sshll.u32 %s240_s4, 4  ;;  %s100_s29 = int_to_ptr.hbm [resolvable:$true] %s99_s29 }
   0x8   :  { %38 = vperm.xlu0 %130, %v33_v1   ;;  %116 = vmatpush.msra.mxu1 %v52_v2  ;;  %v34_v6 = vld [vmem:[%s237_s1 + $0x8] sm:$0xff]  ;;  %v48_v7 = vld [vmem:[#allocation4 + $0x18] sm:$0xff]  ;;  %v47_v8 = vld [vmem:[#allocation4 + $0x10] sm:$0xff]  ;;  %v36_v12 = vand.u32 127, %v35_v11  ;;  %s97_s26 = sshll.u32 %s189_s25, 4  ;;  %s98_s26 = int_to_ptr.vmem [resolvable:$true] %s97_s26 }
   0x9   :  { %77 = vmatpush.msra.mxu0 %v51_v3  ;;  %v46_v9 = vld [vmem:[#allocation4 + $0x8] sm:$0xff]  ;;  %v45_v10 = vld [vmem:[#allocation4] sm:$0xff] }
   0xa   :  { %117 = vmatpush.msra.mxu1 %v51_v3  ;;  %v131_v18 = vld [vmem:[%s239_s3] ss:$0 sm:$0xff] }
   0xb   :  { %78 = vmatpush.msra.mxu0 %v50_v4 }
   0xc   :  { %118 = vmatpush.msra.mxu1 %v50_v4 }
   0xd   :  { %79 = vmatpush.msra.mxu0 %v49_v5 }
   0xe   :  { %119 = vmatpush.msra.mxu1 %v49_v5 }
   0xf   :  { %80 = vmatpush.msra.mxu0 %v48_v7 }
  0x10   :  { %41 = vperm.xlu0 %130, %v34_v6   ;;  %120 = vmatpush.msra.mxu1 %v48_v7 }
  0x11   :  { %81 = vmatpush.msra.mxu0 %v47_v8 }
  0x12   :  { %121 = vmatpush.msra.mxu1 %v47_v8 }
  0x13   :  { %82 = vmatpush.msra.mxu0 %v46_v9 }
  0x14   :  { %122 = vmatpush.msra.mxu1 %v46_v9 }
  0x15   :  { %83 = vmatpush.msra.mxu0 %v45_v10 }
  0x16   :  { %123 = vmatpush.msra.mxu1 %v45_v10 }
  0x7a   :  { %v39_v13 = vpop.permute.xlu0 %38 }
  0x7b   :  { %vm43_vm1 = vcmp.eq.s32.totalorder %v39_v13, %v36_v12 }
  0x7c   :  { %v112_v15 = vsel %vm43_vm1, 1.0, %v188_v14 }
  0x7d   :  { %114 = vmatmul.msk.f32.vlgmr.msra.gmra.mxu0 %vm61_vm0, %v112_v15 }
  0x82   :  { %v42_v16 = vpop.permute.xlu0 %41 }
  0x83   :  { %vm44_vm2 = vcmp.eq.s32.totalorder %v42_v16, %v36_v12 }
  0x84   :  { %v113_v17 = vsel %vm44_vm2, 1.0, %v188_v14 }
  0x85   :  { %115 = vmatmul.msk.f32.vlgmr.msra.gmra.mxu1 %vm61_vm0, %v113_v17 }
  0xfa   :  { %v85_v19 = vpop.f32.mrf.mxu0 }
  0xfb   :  { %v86_v20 = vadd.f32 %v131_v18, %v85_v19 }
  0xfd   :  { %91 = vst [vmem:[#allocation7] sm:$0xff] %v86_v20 }
 0x102   :  { %v88_v21 = vpop.f32.mrf.mxu1 }
 0x103   :  { %v89_v22 = vadd.f32 %v131_v18, %v88_v21 }
 0x105   :  { %92 = vst [vmem:[#allocation7 + $0x8] sm:$0xff] %v89_v22 }
 0x106   :  { %105 = dma.vmem_to_hbm [thread:$0]  %s98_s26, 256, %s100_s29, [#allocation6], %s185_s19, %s185_s19, %s186_s20  }
 0x107   :  { %182 = dma.done.wait [#allocation6], 256  }
 0x108   :  { %183 = vsyncadd [#allocation6], 4294967040 }
 0x109   :  { %110 = vsyncpa [#allocation5], 1 }
 0x10a   :  { %111 = vsyncpa [#allocation6], 1 }

</bundles_post_ra>
